<compile_context>
chip_gen: v6e
topology: v6e:2x2x1
jax: 0.10.0
libtpu: 0.0.40
codegen_flags: <defaults>
</compile_context>

<pallas_src>
import functools

import jax
import jax.numpy as jnp
from jax.experimental import pallas as pl
from jax.experimental.pallas import tpu as pltpu


# ----------------------------------------------------------------------------
# Per-tile math (shared by the serial-accumulator and partial-sum kernels).
# ----------------------------------------------------------------------------

def _row_valid_mask(tile_idx, tile_rows, n_rows):
    """(TN, 1) bool mask of rows inside the true batch (ragged last tile)."""
    row_ids = tile_idx * tile_rows + jax.lax.broadcasted_iota(
        jnp.int32, (tile_rows, 1), 0
    )
    return row_ids < n_rows


def _tile_loss_sum_sparse(x, t, tile_idx, *, epsilon, num_classes, n_rows,
                          tile_rows):
    """(1,1) f32 sum of per-row label-smoothed CE over this tile (sparse tgt)."""
    tn, c = x.shape
    xf = x.astype(jnp.float32)                       # single hoisted cast

    # log-sum-exp per row (f32 accumulation).
    m = jnp.max(xf, axis=1, keepdims=True)                                # (TN,1)
    exp_sum = jnp.sum(jnp.exp(xf - m), axis=1, keepdims=True)             # (TN,1)
    logz = m + jnp.log(exp_sum)                                           # (TN,1)

    # Fused weighted reduce: w_j = eps/C + (1-eps)*[j == t_i];  sum_j w_j = 1.
    w_lo = epsilon / num_classes
    w_hi = (1.0 - epsilon) + w_lo
    class_ids = jax.lax.broadcasted_iota(jnp.int32, (1, c), 1)            # (1,C)
    w = jnp.where(class_ids == t, w_hi, w_lo)                             # (TN,C)
    wx = jnp.sum(w * xf, axis=1, keepdims=True)                           # (TN,1)

    per_row = logz - wx                                                   # (TN,1)

    if (n_rows % tile_rows) != 0:                    # static Python bool
        valid = _row_valid_mask(tile_idx, tile_rows, n_rows)
        per_row = jnp.where(valid, per_row, 0.0)     # select (not multiply)

    return jnp.sum(per_row, axis=0, keepdims=True)                        # (1,1)


def _tile_loss_sum_dense(x, tgt, tile_idx, *, epsilon, num_classes, n_rows,
                         tile_rows):
    """(1,1) f32 sum of per-row label-smoothed CE over this tile (dense tgt)."""
    xf = x.astype(jnp.float32)                       # single hoisted cast

    m = jnp.max(xf, axis=1, keepdims=True)
    exp_sum = jnp.sum(jnp.exp(xf - m), axis=1, keepdims=True)
    logz = m + jnp.log(exp_sum)

    # w = (1-eps)*tgt + eps/C;  loss_i = logZ_i * sum(w) - sum(w * x).
    w = (1.0 - epsilon) * tgt.astype(jnp.float32) + (epsilon / num_classes)
    wsum = jnp.sum(w, axis=1, keepdims=True)
    wx = jnp.sum(w * xf, axis=1, keepdims=True)

    per_row = logz * wsum - wx

    if (n_rows % tile_rows) != 0:
        valid = _row_valid_mask(tile_idx, tile_rows, n_rows)
        per_row = jnp.where(valid, per_row, 0.0)

    return jnp.sum(per_row, axis=0, keepdims=True)


# ----------------------------------------------------------------------------
# Kernels.
# ----------------------------------------------------------------------------

def _accum_kernel(x_ref, t_ref, o_ref, *, tile_fn):
    """Serial resident (1,1) accumulator; grid axis must be 'arbitrary'."""
    i = pl.program_id(0)
    tile_sum = tile_fn(x_ref[...], t_ref[...], i)

    @pl.when(i == 0)
    def _():
        o_ref[...] = jnp.zeros_like(o_ref)

    o_ref[...] += tile_sum


def _partial_kernel(x_ref, t_ref, o_ref, *, tile_fn):
    """Per-tile partial sums; grid axis may be 'parallel' (2 TCs on v7x)."""
    i = pl.program_id(0)
    o_ref[...] = tile_fn(x_ref[...], t_ref[...], i)


# ----------------------------------------------------------------------------
# Wrapper.
# ----------------------------------------------------------------------------

def _pick_tile_rows(n, c, itemsize, byte_cap, tile_rows=None):
    """Largest packing-aligned row tile with <= byte_cap bytes per input buffer."""
    mult = max(8, 8 * (4 // max(1, itemsize)))       # 8 f32, 16 bf16, 32 int8
    if tile_rows is None:
        bytes_per_row = max(c * itemsize, 1)
        tile_rows = max(mult, byte_cap // bytes_per_row)
    tile_rows = int(tile_rows)
    if tile_rows >= n:
        return n                                     # full-extent block: legal
    return max(mult, (tile_rows // mult) * mult)


def _is_v7x():
    try:
        kind = jax.devices()[0].device_kind.lower()
        return "v7" in kind
    except Exception:
        return False


def cross_entropy_label_smooth(
    x, target, *, num_classes, epsilon=0.1, sparse_target=True, reduction="avg",
    tile_rows=None, partial_sums=None,
):
    """Pallas implementation of CrossEntropyLabelSmooth.forward.

    x:       (N, C) float logits (f32 or bf16; streamed in native dtype)
    target:  (N,) int class indices if sparse_target else (N, C) float
    returns: scalar f32 loss ('avg' or 'sum' reduction)
    """
    if reduction not in ("avg", "sum"):
        # TODO(synk): the module's unreduced (N, C) loss tensor path is not implemented.
        raise NotImplementedError(
            f"reduction={reduction!r} not supported; use 'avg' or 'sum'."
        )

    n, c = x.shape
    assert c == num_classes

    itemsize = jnp.dtype(x.dtype).itemsize
    byte_cap = (8 << 20) if sparse_target else (6 << 20)
    tn = _pick_tile_rows(n, c, itemsize, byte_cap, tile_rows)
    num_tiles = pl.cdiv(n, tn)

    if partial_sums is None:
        partial_sums = _is_v7x() and num_tiles > 1   # use both TCs on v7x

    x_spec = pl.BlockSpec((tn, c), lambda i: (i, 0))

    if sparse_target:
        tile_fn = functools.partial(
            _tile_loss_sum_sparse,
            epsilon=float(epsilon), num_classes=int(num_classes),
            n_rows=int(n), tile_rows=int(tn),
        )
        t_in = target.astype(jnp.int32).reshape(n, 1)
        t_spec = pl.BlockSpec((tn, 1), lambda i: (i, 0))
    else:
        tile_fn = functools.partial(
            _tile_loss_sum_dense,
            epsilon=float(epsilon), num_classes=int(num_classes),
            n_rows=int(n), tile_rows=int(tn),
        )
        t_in = target                                # native dtype, same tiling as x
        t_spec = pl.BlockSpec((tn, c), lambda i: (i, 0))

    vmem_limit = 48 * 1024 * 1024                    # < 64 MiB (v7x physical)

    if partial_sums:
        partials = pl.pallas_call(
            functools.partial(_partial_kernel, tile_fn=tile_fn),
            out_shape=jax.ShapeDtypeStruct((num_tiles, 1), jnp.float32),
            grid=(num_tiles,),
            in_specs=[x_spec, t_spec],
            out_specs=pl.BlockSpec((1, 1), lambda i: (i, 0)),
            compiler_params=pltpu.CompilerParams(
                dimension_semantics=("parallel",),
                vmem_limit_bytes=vmem_limit,
            ),
        )(x, t_in)
        total = jnp.sum(partials)
    else:
        total = pl.pallas_call(
            functools.partial(_accum_kernel, tile_fn=tile_fn),
            out_shape=jax.ShapeDtypeStruct((1, 1), jnp.float32),
            grid=(num_tiles,),
            in_specs=[x_spec, t_spec],
            out_specs=pl.BlockSpec((1, 1), lambda i: (0, 0)),  # resident accumulator
            compiler_params=pltpu.CompilerParams(
                dimension_semantics=("arbitrary",),
                vmem_limit_bytes=vmem_limit,
            ),
        )(x, t_in)[0, 0]

    if reduction == "avg":
        return total / n
    return total


# ----------------------------------------------------------------------------
# Pure-JAX reference & self-test.
# ----------------------------------------------------------------------------

def _reference(x, target, *, num_classes, epsilon=0.1, sparse_target=True,
               reduction="avg"):
    log_probs = jax.nn.log_softmax(x.astype(jnp.float32), axis=1)
    if sparse_target:
        tgt = jax.nn.one_hot(target, num_classes, dtype=jnp.float32)
    else:
        tgt = target.astype(jnp.float32)
    tgt = (1.0 - epsilon) * tgt + epsilon / num_classes
    loss = -tgt * log_probs
    if reduction == "avg":
        return loss.mean(0).sum()
    elif reduction == "sum":
        return loss.sum()
    return loss


if __name__ == "__main__":
    key = jax.random.PRNGKey(0)
    k_logits, k_target, k_big = jax.random.split(key, 3)

    # --- primary small case: batch=8, num_classes=16, sparse targets, 'avg' ---
    batch, num_classes = 8, 16
    x = jax.random.normal(k_logits, (batch, num_classes), dtype=jnp.float32)
    target = jax.random.randint(k_target, (batch,), 0, num_classes, dtype=jnp.int32)

    loss = cross_entropy_label_smooth(
        x, target, num_classes=num_classes, epsilon=0.1,
        sparse_target=True, reduction="avg",
    )
    loss = jax.block_until_ready(loss)
    ref = _reference(x, target, num_classes=num_classes, epsilon=0.1,
                     sparse_target=True, reduction="avg")
    assert jnp.allclose(loss, ref, atol=1e-4, rtol=1e-5), (loss, ref)

    # --- multi-tile + ragged tail, bf16 logits, 'sum', partial-sum (parallel) path ---
    batch2 = 36
    xb = jax.random.normal(k_big, (batch2, num_classes)).astype(jnp.bfloat16)
    tb = jax.random.randint(k_target, (batch2,), 0, num_classes, dtype=jnp.int32)
    loss2 = cross_entropy_label_smooth(
        xb, tb, num_classes=num_classes, epsilon=0.1,
        sparse_target=True, reduction="sum",
        tile_rows=16, partial_sums=True,             # grid=3, ragged tail, parallel
    )
    loss2 = jax.block_until_ready(loss2)
    ref2 = _reference(xb.astype(jnp.float32), tb, num_classes=num_classes,
                      epsilon=0.1, sparse_target=True, reduction="sum")
    assert jnp.allclose(loss2, ref2, atol=5e-3, rtol=1e-4), (loss2, ref2)

    # --- same inputs through the serial-accumulator path ---
    loss2b = cross_entropy_label_smooth(
        xb, tb, num_classes=num_classes, epsilon=0.1,
        sparse_target=True, reduction="sum",
        tile_rows=16, partial_sums=False,
    )
    loss2b = jax.block_until_ready(loss2b)
    assert jnp.allclose(loss2b, ref2, atol=5e-3, rtol=1e-4), (loss2b, ref2)

    # --- dense (distribution) target path ---
    tgt_dense = jax.nn.softmax(
        jax.random.normal(k_target, (batch, num_classes), dtype=jnp.float32), axis=1)
    loss3 = cross_entropy_label_smooth(
        x, tgt_dense, num_classes=num_classes, epsilon=0.1,
        sparse_target=False, reduction="avg",
    )
    loss3 = jax.block_until_ready(loss3)
    ref3 = _reference(x, tgt_dense, num_classes=num_classes, epsilon=0.1,
                      sparse_target=False, reduction="avg")
    assert jnp.allclose(loss3, ref3, atol=1e-4, rtol=1e-5), (loss3, ref3)

    print("KERNEL_OK")
</pallas_src>

<mosaic_0001>
module attributes {stable_mosaic.version = 11 : i64} {
  func.func @_accum_kernel(%arg0: i32, %arg1: memref<8x16xf32, #tpu.memory_space<vmem>>, %arg2: memref<8x1xi32, #tpu.memory_space<vmem>>, %arg3: memref<1x1xf32, #tpu.memory_space<vmem>>) attributes {dimension_semantics = [#tpu.dimension_semantics<arbitrary>], iteration_bounds = array<i64: 1>, scalar_prefetch = 0 : i64, scratch_operands = 0 : i64, tpu.core_type = #tpu.core_type<tc>, window_params = [{transform_indices = @transform_0, window_bounds = array<i64: 8, 16>}, {transform_indices = @transform_1, window_bounds = array<i64: 8, 1>}, {pipeline_mode = #tpu.pipeline_mode<synchronous>, transform_indices = @transform_2, window_bounds = array<i64: 1, 1>}]} {
    %c0 = arith.constant 0 : index
    %c0_0 = arith.constant 0 : index
    %0 = vector.load %arg1[%c0, %c0_0] : memref<8x16xf32, #tpu.memory_space<vmem>>, vector<8x16xf32>
    %c0_1 = arith.constant 0 : index
    %c0_2 = arith.constant 0 : index
    %1 = vector.load %arg2[%c0_1, %c0_2] : memref<8x1xi32, #tpu.memory_space<vmem>>, vector<8x1xi32>
    %cst = arith.constant dense<0xFF800000> : vector<8xf32>
    %2 = vector.multi_reduction <maximumf>, %0, %cst [1] : vector<8x16xf32> to vector<8xf32>
    %3 = vector.shape_cast %2 : vector<8xf32> to vector<8x1xf32>
    %4 = vector.broadcast %3 : vector<8x1xf32> to vector<8x16xf32>
    %5 = arith.subf %0, %4 : vector<8x16xf32>
    %6 = math.exp %5 : vector<8x16xf32>
    %cst_3 = arith.constant dense<0.000000e+00> : vector<8xf32>
    %7 = vector.multi_reduction <add>, %6, %cst_3 [1] : vector<8x16xf32> to vector<8xf32>
    %8 = vector.shape_cast %7 : vector<8xf32> to vector<8x1xf32>
    %9 = math.log %8 : vector<8x1xf32>
    %10 = arith.addf %3, %9 : vector<8x1xf32>
    %11 = tpu.iota {dimensions = array<i32: 1>} : vector<1x16xi32>
    %12 = vector.broadcast %11 : vector<1x16xi32> to vector<8x16xi32>
    %13 = vector.broadcast %1 : vector<8x1xi32> to vector<8x16xi32>
    %14 = arith.cmpi eq, %12, %13 : vector<8x16xi32>
    %cst_4 = arith.constant 9.062500e-01 : f32
    %cst_5 = arith.constant 6.250000e-03 : f32
    %15 = vector.broadcast %cst_4 : f32 to vector<8x16xf32>
    %16 = vector.broadcast %cst_5 : f32 to vector<8x16xf32>
    %17 = arith.select %14, %15, %16 : vector<8x16xi1>, vector<8x16xf32>
    %18 = arith.mulf %17, %0 : vector<8x16xf32>
    %cst_6 = arith.constant dense<0.000000e+00> : vector<8xf32>
    %19 = vector.multi_reduction <add>, %18, %cst_6 [1] : vector<8x16xf32> to vector<8xf32>
    %20 = vector.shape_cast %19 : vector<8xf32> to vector<8x1xf32>
    %21 = arith.subf %10, %20 : vector<8x1xf32>
    %cst_7 = arith.constant dense<0.000000e+00> : vector<1xf32>
    %22 = vector.multi_reduction <add>, %21, %cst_7 [0] : vector<8x1xf32> to vector<1xf32>
    %23 = vector.shape_cast %22 : vector<1xf32> to vector<1x1xf32>
    %c0_i32 = arith.constant 0 : i32
    %24 = arith.cmpi eq, %arg0, %c0_i32 : i32
    %25 = arith.extui %24 : i1 to i32
    %c0_i32_8 = arith.constant 0 : i32
    %26 = arith.cmpi ne, %25, %c0_i32_8 : i32
    scf.if %26 {
      %cst_13 = arith.constant 0.000000e+00 : f32
      %30 = vector.broadcast %cst_13 : f32 to vector<1x1xf32>
      %c0_14 = arith.constant 0 : index
      %c0_15 = arith.constant 0 : index
      %31 = vector.load %arg3[%c0_14, %c0_15] : memref<1x1xf32, #tpu.memory_space<vmem>>, vector<1x1xf32>
      tpu.vector_store %arg3[%c0_14, %c0_15], %30 {strides = array<i32>} : memref<1x1xf32, #tpu.memory_space<vmem>>, vector<1x1xf32>,
    } else {
    }
    %c0_9 = arith.constant 0 : index
    %c0_10 = arith.constant 0 : index
    %27 = vector.load %arg3[%c0_9, %c0_10] : memref<1x1xf32, #tpu.memory_space<vmem>>, vector<1x1xf32>
    %28 = arith.addf %27, %23 : vector<1x1xf32>
    %c0_11 = arith.constant 0 : index
    %c0_12 = arith.constant 0 : index
    %29 = vector.load %arg3[%c0_11, %c0_12] : memref<1x1xf32, #tpu.memory_space<vmem>>, vector<1x1xf32>
    tpu.vector_store %arg3[%c0_11, %c0_12], %28 {strides = array<i32>} : memref<1x1xf32, #tpu.memory_space<vmem>>, vector<1x1xf32>,
    return
  }
  func.func @transform_0(%arg0: i32) -> (i32, i32) {
    %c0_i32 = arith.constant 0 : i32
    %c0_i32_0 = arith.constant 0 : i32
    return %arg0, %c0_i32 : i32, i32
  }
  func.func @transform_1(%arg0: i32) -> (i32, i32) {
    %c0_i32 = arith.constant 0 : i32
    %c0_i32_0 = arith.constant 0 : i32
    return %arg0, %c0_i32 : i32, i32
  }
  func.func @transform_2(%arg0: i32) -> (i32, i32) {
    %c0_i32 = arith.constant 0 : i32
    %c0_i32_0 = arith.constant 0 : i32
    %c0_i32_1 = arith.constant 0 : i32
    return %c0_i32, %c0_i32_0 : i32, i32
  }
}

</mosaic_0001>

<bundles_post_ra>
// kernel: tpu_custom_call.1
= control target key start
LH: loop header
LB: loop body
LE: loop exit
PB: predicated region body
PF: predicated region fallthrough
CT: control target
= control target key end

     0   :  { %vm14_vm0 = vcmask 130048   ;;  %s133_s0 = inlined_call_operand.vmem [shape: f32[8,16], index: 0, kind: input, shape index: {}]   ;;  %s134_s1 = inlined_call_operand.vmem [shape: s32[8,1], index: 1, kind: input, shape index: {}]   ;;  %s135_s2 = inlined_call_operand.hbm [shape: f32[1,1], index: 2, kind: output, shape index: {}]  }
   0x1   :  { %v12_v0 = vld [vmem:[%s133_s0] sm:$0xff] }
   0x2   :  { %7 = vsyncpa [#allocation3], 0  ;;  %v15_v1 = vsel %vm14_vm0, %v12_v0, -inf  ;;  %v100_v2 = vmov 0   ;;  %v13_v3 = vld [vmem:[%s134_s1] sm:$0xff]  ;;  %v27_v7 = vlaneseq  ;;  %vm49_vm2 = vcmask 0  }
   0x3   :  { %73 = vset.pattern.permute.xlu0 %v100_v2  ;;  %v101_v10 = vmov 0.00625   ;;  %v102_v16 = vmov 0.0   ;;  %s103_s0 = smov [#allocation2]  }
   0x4   :  { %16 = vmax.xlane.f32.xlu0 %v15_v1  ;;  %v28_v8 = vand.u32 127, %v27_v7  ;;  %50 = vst.msk [vmem:[#allocation2] sm:$0x1] %vm49_vm2, %v102_v16  ;;  %s61_s1 = sshll.u32 %s103_s0, 4  ;;  %s62_s1 = int_to_ptr.vmem [resolvable:$true] %s61_s1 }
   0x5   :  { %s78_s13 = scalar_lea.vmem %s62_s1, 16  ;;  %s82_s14 = scalar_lea.vmem %s62_s1, 32 }
   0x6   :  { %p79_p0 = scmp.ne.s32.totalorder %s62_s1, %s78_s13  ;;  %p83_p1 = scmp.lt.s32.totalorder %s62_s1, %s62_s1 }
   0x7   :  { %p84_p2 = scmp.lt.s32.totalorder %s82_s14, %s78_s13 }
   0x9   :  { %p85_p3 = por %p84_p2, %p83_p1 }
   0xb   :  { %v51_v28 = vld [vmem:[#allocation2] sm:$0x1]  ;;  %p86_p4 = pnand %p85_p3, %p79_p0 }
  0x1a   :  { %30 = vperm.xlu0 %73, %v13_v3  }
  0x8d   :  { %v17_v4 = vpop.xlane.xlu0 %16 }
  0x8e   :  { %v18_v5 = vsub.f32 %v12_v0, %v17_v4 }
  0x90   :  { %v19_v6 = vmul.f32 1.442695, %v18_v5 }
  0x92   :  { %74 = vpow2.f32 %v19_v6 }
  0x95   :  { %v31_v9 = vpop.permute.xlu0 %30 }
  0x96   :  { %vm32_vm1 = vcmp.eq.s32.totalorder %v28_v8, %v31_v9 }
  0x97   :  { %v33_v11 = vsel %vm32_vm1, 0.90625, %v101_v10 }
  0x98   :  { %v34_v12 = vmul.f32 %v33_v11, %v12_v0 }
  0x9a   :  { %v35_v15 = vsel %vm14_vm0, %v34_v12, 0.0 }
  0x9f   :  { %v75_v13 = vpop.eup %74 }
  0xa0   :  { %v21_v14 = vsel %vm14_vm0, %v75_v13, 0.0 }
  0xa1   :  { %22 = vadd.xlane.f32.xlu1 %v21_v14 }
  0xa5   :  { %36 = vadd.xlane.f32.xlu1 %v35_v15 }
 0x12a   :  { %v23_v17 = vpop.xlane.xlu1 %22 }
 0x12b   :  { %76 = vlog2.f32 %v23_v17 }
 0x12e   :  { %v37_v20 = vpop.xlane.xlu1 %36 }
 0x138   :  { %v77_v18 = vpop.eup %76 }
 0x139   :  { %v25_v19 = vmul.f32 0.6931472, %v77_v18 }
 0x13b   :  { %v26_v21 = vadd.f32 %v25_v19, %v17_v4 }
 0x13d   :  { %v38_v22 = vsub.f32 %v26_v21, %v37_v20 }
 0x13f   :  { %v39_v23 = vrot.slane %v38_v22, 4 }
 0x141   :  { %v40_v24 = vadd.f32 %v39_v23, %v38_v22 }
 0x143   :  { %v41_v25 = vrot.slane %v40_v24, 2 }
 0x145   :  { %v42_v26 = vadd.f32 %v41_v25, %v40_v24 }
 0x147   :  { %v43_v27 = vrot.slane %v42_v26, 1 }
 0x149   :  { %v44_v29 = vadd.f32 %v43_v27, %v42_v26 }
 0x14b   :  { %v52_v30 = vadd.f32 %v51_v28, %v44_v29 }
 0x14d   :  { %54 = vst.msk [vmem:[#allocation2] sm:$0x1] %vm49_vm2, %v52_v30 }
 0x14e   :  { %89 = shalt.err (!%p86_p4)
}
 0x14f   :  { %64 = dma.vmem_to_hbm [thread:$0]  %s62_s1, 16, %s135_s2, [#allocation3]  }
 0x150   :  { %98 = dma.done.wait [#allocation3], 16  }
 0x151   :  { %99 = vsyncadd [#allocation3], 4294967280 }
 0x152   :  { %68 = vsyncpa [#allocation3], 1 }

</bundles_post_ra>
